<compile_context>
chip_gen: v7x
topology: tpu7x:2x2x1
jax: 0.10.0
libtpu: 0.0.40
codegen_flags: <defaults>
</compile_context>

<pallas_src>
import math

import jax
import jax.numpy as jnp
from jax.experimental import pallas as pl
from jax.experimental.pallas import tpu as pltpu


def _make_kernel(B, TB, I, H):
    two_h = 2 * H

    def kernel(x_ref, h0_ref, wcat_ref, pcat_ref, bcat_ref, out_ref, r_ref):
        # Initialize recurrent state from `hidden` on the first time-chunk.
        @pl.when(pl.program_id(0) == 0)
        def _():
            r_ref[...] = h0_ref[...]

        # Hoist weight loads out of the per-step loop.
        wcat = wcat_ref[...]                                   # (H, 2H)
        pcat = pcat_ref[...]                                   # (I, 2H)

        # One wide MXU call computes the input projection for the whole chunk,
        # with the bias folded in (bcat is (1, 2H) -> broadcasts over (B, TB, 2H)).
        xp = jnp.einsum("bti,ih->bth", x_ref[...], pcat,
                        preferred_element_type=jnp.float32)    # (B, TB, 2H)
        xp = xp + bcat_ref[...]

        r = r_ref[...]                                         # (B, H)

        # Statically unrolled recurrence over the TB timesteps of this chunk;
        # only the recurrent matmul + gate math remain inside the loop.
        for s in range(TB):
            pre = (jnp.dot(r, wcat, preferred_element_type=jnp.float32)
                   + xp[:, s, :])                              # (B, 2H) = [z | cand]
            z = jax.nn.sigmoid(pre[:, :H])
            cand = jax.nn.sigmoid(pre[:, H:])
            r = r + z * (cand - r)                             # == (1-z)*r + z*cand
            # output_mask in the torch module is all-ones -> outputs[:, t, :] = r_t
            out_ref[:, s, :] = r

        r_ref[...] = r                                         # carry to next chunk

    return kernel


def multiscale_rnn_batch(x, hidden, params, *, time_block=None):
    """x: (B, T, I) float32 (batch_first=True); hidden: (B, H) float32.

    Returns (outputs (B, T, H), r_final (B, H)) — same as the torch forward.
    """
    B, T, I = x.shape
    H = hidden.shape[1]

    W, P, b_v = params["W"], params["P"], params["b_v"]
    W_z, P_z, b_z = params["W_z"], params["P_z"], params["b_z"]

    # input_mask: zero rows [H//2:] of P before the candidate projection.
    mask = jnp.ones_like(P).at[H // 2:, :].set(0.0)

    # Fused, right-multiply-layout weights: one wide matmul computes both gates.
    wcat = jnp.concatenate([W_z.T, W.T], axis=1).astype(jnp.float32)            # (H, 2H)
    pcat = jnp.concatenate([P_z.T, (P * mask).T], axis=1).astype(jnp.float32)   # (I, 2H)
    bcat = jnp.concatenate([b_z.T, b_v.T], axis=1).astype(jnp.float32)          # (1, 2H)

    # Time-chunk size: a multiple of 8 (sublane rule for the (TB, I)/(TB, H)
    # trailing block dims), large enough to amortize per-grid-step overhead.
    if time_block is None:
        time_block = min(32, 8 * (-(-T // 8)))
    TB = int(time_block)
    T_pad = (-(-T // TB)) * TB

    x_f = x.astype(jnp.float32)
    if T_pad != T:
        # Padded steps produce rows >= T which are sliced away below; r_final is
        # taken from row T-1, so no masking of the recurrence is needed.
        x_f = jnp.pad(x_f, ((0, 0), (0, T_pad - T), (0, 0)))

    kernel = _make_kernel(B, TB, I, H)

    def const(shape):
        # Full-array block, constant across the time-chunk grid.
        return pl.BlockSpec(shape, lambda c, _s=shape: tuple(0 for _ in _s))

    out_full = pl.pallas_call(
        kernel,
        out_shape=jax.ShapeDtypeStruct((B, T_pad, H), jnp.float32),
        grid_spec=pltpu.PrefetchScalarGridSpec(
            num_scalar_prefetch=0,
            grid=(T_pad // TB,),
            in_specs=[
                pl.BlockSpec((B, TB, I), lambda c: (0, c, 0)),  # x time-chunk
                const((B, H)),          # hidden
                const((H, 2 * H)),      # [W_z^T | W^T]
                const((I, 2 * H)),      # [P_z^T | (P*mask)^T]
                const((1, 2 * H)),      # [b_z^T | b_v^T]
            ],
            out_specs=pl.BlockSpec((B, TB, H), lambda c: (0, c, 0)),
            scratch_shapes=[pltpu.VMEM((B, H), jnp.float32)],   # recurrent state
        ),
        compiler_params=pltpu.CompilerParams(
            dimension_semantics=("arbitrary",)),  # time is a true recurrence
    )(x_f, hidden.astype(jnp.float32), wcat, pcat, bcat)

    outputs = out_full[:, :T, :]
    # output_mask is all-ones, so the final hidden state equals the last output row.
    r_final = out_full[:, T - 1, :]
    return outputs, r_final


def init_params(key, input_size, hidden_size):
    """Deterministic init matching torch: uniform(-1/sqrt(H), 1/sqrt(H)) for all params."""
    bound = 1.0 / math.sqrt(hidden_size)
    ks = jax.random.split(key, 6)
    u = lambda k, shape: jax.random.uniform(k, shape, jnp.float32, -bound, bound)
    return {
        "W": u(ks[0], (hidden_size, hidden_size)),
        "P": u(ks[1], (hidden_size, input_size)),
        "b_v": u(ks[2], (hidden_size, 1)),
        "W_z": u(ks[3], (hidden_size, hidden_size)),
        "P_z": u(ks[4], (hidden_size, input_size)),
        "b_z": u(ks[5], (hidden_size, 1)),
    }


def reference(x, hidden, params):
    """Pure-JAX reference of the torch forward, for correctness checking."""
    W, P, b_v = params["W"], params["P"], params["b_v"]
    W_z, P_z, b_z = params["W_z"], params["P_z"], params["b_z"]
    H = hidden.shape[1]
    Pm = P * jnp.ones_like(P).at[H // 2:, :].set(0.0)

    def step(r, xt):
        z = jax.nn.sigmoid(r @ W_z.T + xt @ P_z.T + b_z.T)
        cand = jax.nn.sigmoid(r @ W.T + xt @ Pm.T + b_v.T)
        r_new = (1.0 - z) * r + z * cand
        return r_new, r_new

    r_final, outs = jax.lax.scan(step, hidden, jnp.transpose(x, (1, 0, 2)))
    return jnp.transpose(outs, (1, 0, 2)), r_final


if __name__ == "__main__":
    B, T, I, H = 4, 8, 3, 32   # small FlipFlop-style shapes: 3-bit input, hidden=32

    key = jax.random.PRNGKey(0)
    k_p, k_x, k_h = jax.random.split(key, 3)
    params = init_params(k_p, I, H)
    x = jax.random.normal(k_x, (B, T, I), jnp.float32)
    hidden = jax.random.normal(k_h, (B, H), jnp.float32)

    outputs, r_final = jax.jit(multiscale_rnn_batch)(x, hidden, params)
    outputs = jax.block_until_ready(outputs)
    r_final = jax.block_until_ready(r_final)

    ref_out, ref_r = reference(x, hidden, params)
    assert outputs.shape == (B, T, H) and r_final.shape == (B, H)
    assert jnp.allclose(outputs, ref_out, atol=1e-5, rtol=1e-5)
    assert jnp.allclose(r_final, ref_r, atol=1e-5, rtol=1e-5)

    print("KERNEL_OK")
</pallas_src>

<mosaic_0001>
module attributes {stable_mosaic.version = 11 : i64} {
  func.func @kernel(%arg0: i32, %arg1: memref<4x8x3xf32, #tpu.memory_space<vmem>>, %arg2: memref<4x32xf32, #tpu.memory_space<vmem>>, %arg3: memref<32x64xf32, #tpu.memory_space<vmem>>, %arg4: memref<3x64xf32, #tpu.memory_space<vmem>>, %arg5: memref<1x64xf32, #tpu.memory_space<vmem>>, %arg6: memref<4x8x32xf32, #tpu.memory_space<vmem>>, %arg7: memref<4x32xf32, #tpu.memory_space<vmem>>) attributes {dimension_semantics = [#tpu.dimension_semantics<arbitrary>], iteration_bounds = array<i64: 1>, scalar_prefetch = 0 : i64, scratch_operands = 1 : i64, tpu.core_type = #tpu.core_type<tc>, window_params = [{transform_indices = @transform_0, window_bounds = array<i64: 4, 8, 3>}, {pipeline_mode = #tpu.pipeline_mode<synchronous>, transform_indices = @transform_1, window_bounds = array<i64: 4, 32>}, {pipeline_mode = #tpu.pipeline_mode<synchronous>, transform_indices = @transform_2, window_bounds = array<i64: 32, 64>}, {pipeline_mode = #tpu.pipeline_mode<synchronous>, transform_indices = @transform_3, window_bounds = array<i64: 3, 64>}, {pipeline_mode = #tpu.pipeline_mode<synchronous>, transform_indices = @transform_4, window_bounds = array<i64: 1, 64>}, {transform_indices = @transform_5, window_bounds = array<i64: 4, 8, 32>}]} {
    %c0_i32 = arith.constant 0 : i32
    %0 = arith.cmpi eq, %arg0, %c0_i32 : i32
    %1 = arith.extui %0 : i1 to i32
    %c0_i32_0 = arith.constant 0 : i32
    %2 = arith.cmpi ne, %1, %c0_i32_0 : i32
    scf.if %2 {
      %c0_54 = arith.constant 0 : index
      %c0_55 = arith.constant 0 : index
      %189 = vector.load %arg2[%c0_54, %c0_55] : memref<4x32xf32, #tpu.memory_space<vmem>>, vector<4x32xf32>
      %c0_56 = arith.constant 0 : index
      %c0_57 = arith.constant 0 : index
      %190 = vector.load %arg7[%c0_56, %c0_57] : memref<4x32xf32, #tpu.memory_space<vmem>>, vector<4x32xf32>
      tpu.vector_store %arg7[%c0_56, %c0_57], %189 {strides = array<i32>} : memref<4x32xf32, #tpu.memory_space<vmem>>, vector<4x32xf32>,
    } else {
    }
    %c0 = arith.constant 0 : index
    %c0_1 = arith.constant 0 : index
    %3 = vector.load %arg3[%c0, %c0_1] : memref<32x64xf32, #tpu.memory_space<vmem>>, vector<32x64xf32>
    %c0_2 = arith.constant 0 : index
    %c0_3 = arith.constant 0 : index
    %4 = vector.load %arg4[%c0_2, %c0_3] : memref<3x64xf32, #tpu.memory_space<vmem>>, vector<3x64xf32>
    %c0_4 = arith.constant 0 : index
    %c0_5 = arith.constant 0 : index
    %c0_6 = arith.constant 0 : index
    %5 = vector.load %arg1[%c0_4, %c0_5, %c0_6] : memref<4x8x3xf32, #tpu.memory_space<vmem>>, vector<4x8x3xf32>
    "tpu.trace_start"() <{level = 10 : i32, message = "bti,ih->bth"}> : () -> ()
    %cst = arith.constant dense<0.000000e+00> : vector<4x8x64xf32>
    %6 = tpu.matmul %5, %4, %cst {dimension_numbers = #tpu.dot_dimension_numbers<[2], [0], [0, 1], [1], [0, 0, 0, 1, 1, 1], [], []>} : vector<4x8x3xf32>, vector<3x64xf32>, vector<4x8x64xf32> -> vector<4x8x64xf32>
    "tpu.trace_stop"() : () -> ()
    %c0_7 = arith.constant 0 : index
    %c0_8 = arith.constant 0 : index
    %7 = vector.load %arg5[%c0_7, %c0_8] : memref<1x64xf32, #tpu.memory_space<vmem>>, vector<1x64xf32>
    %8 = vector.shape_cast %7 : vector<1x64xf32> to vector<1x1x64xf32>
    %9 = vector.broadcast %8 : vector<1x1x64xf32> to vector<4x8x64xf32>
    %10 = arith.addf %6, %9 : vector<4x8x64xf32>
    %c0_9 = arith.constant 0 : index
    %c0_10 = arith.constant 0 : index
    %11 = vector.load %arg7[%c0_9, %c0_10] : memref<4x32xf32, #tpu.memory_space<vmem>>, vector<4x32xf32>
    %cst_11 = arith.constant dense<0.000000e+00> : vector<4x64xf32>
    %12 = tpu.matmul %11, %3, %cst_11 {dimension_numbers = #tpu.dot_dimension_numbers<[1], [0], [0], [1], [0, 0, 1, 1], [], []>} : vector<4x32xf32>, vector<32x64xf32>, vector<4x64xf32> -> vector<4x64xf32>
    %13 = vector.extract_strided_slice %10 {offsets = [0, 0, 0], sizes = [4, 1, 64], strides = [1, 1, 1]} : vector<4x8x64xf32> to vector<4x1x64xf32>
    %14 = vector.shape_cast %13 : vector<4x1x64xf32> to vector<4x64xf32>
    %15 = arith.addf %12, %14 : vector<4x64xf32>
    %16 = vector.extract_strided_slice %15 {offsets = [0, 0], sizes = [4, 32], strides = [1, 1]} : vector<4x64xf32> to vector<4x32xf32>
    %17 = arith.negf %16 : vector<4x32xf32>
    %18 = math.exp %17 : vector<4x32xf32>
    %cst_12 = arith.constant 1.000000e+00 : f32
    %19 = vector.broadcast %cst_12 : f32 to vector<4x32xf32>
    %20 = arith.addf %19, %18 : vector<4x32xf32>
    %21 = arith.divf %19, %20 : vector<4x32xf32>
    %22 = vector.extract_strided_slice %15 {offsets = [0, 32], sizes = [4, 32], strides = [1, 1]} : vector<4x64xf32> to vector<4x32xf32>
    %23 = arith.negf %22 : vector<4x32xf32>
    %24 = math.exp %23 : vector<4x32xf32>
    %cst_13 = arith.constant 1.000000e+00 : f32
    %25 = vector.broadcast %cst_13 : f32 to vector<4x32xf32>
    %26 = arith.addf %25, %24 : vector<4x32xf32>
    %27 = arith.divf %25, %26 : vector<4x32xf32>
    %28 = arith.subf %27, %11 : vector<4x32xf32>
    %29 = arith.mulf %21, %28 : vector<4x32xf32>
    %30 = arith.addf %11, %29 : vector<4x32xf32>
    %c0_14 = arith.constant 0 : index
    %c0_15 = arith.constant 0 : index
    %c0_16 = arith.constant 0 : index
    %31 = vector.load %arg6[%c0_14, %c0_15, %c0_16] : memref<4x8x32xf32, #tpu.memory_space<vmem>>, vector<4x1x32xf32>
    %32 = vector.shape_cast %31 : vector<4x1x32xf32> to vector<4x32xf32>
    %33 = vector.shape_cast %30 : vector<4x32xf32> to vector<4x1x32xf32>
    tpu.vector_store %arg6[%c0_14, %c0_15, %c0_16], %33 {strides = array<i32>} : memref<4x8x32xf32, #tpu.memory_space<vmem>>, vector<4x1x32xf32>,
    %cst_17 = arith.constant dense<0.000000e+00> : vector<4x64xf32>
    %34 = tpu.matmul %30, %3, %cst_17 {dimension_numbers = #tpu.dot_dimension_numbers<[1], [0], [0], [1], [0, 0, 1, 1], [], []>} : vector<4x32xf32>, vector<32x64xf32>, vector<4x64xf32> -> vector<4x64xf32>
    %35 = vector.extract_strided_slice %10 {offsets = [0, 1, 0], sizes = [4, 1, 64], strides = [1, 1, 1]} : vector<4x8x64xf32> to vector<4x1x64xf32>
    %36 = vector.shape_cast %35 : vector<4x1x64xf32> to vector<4x64xf32>
    %37 = arith.addf %34, %36 : vector<4x64xf32>
    %38 = vector.extract_strided_slice %37 {offsets = [0, 0], sizes = [4, 32], strides = [1, 1]} : vector<4x64xf32> to vector<4x32xf32>
    %39 = arith.negf %38 : vector<4x32xf32>
    %40 = math.exp %39 : vector<4x32xf32>
    %cst_18 = arith.constant 1.000000e+00 : f32
    %41 = vector.broadcast %cst_18 : f32 to vector<4x32xf32>
    %42 = arith.addf %41, %40 : vector<4x32xf32>
    %43 = arith.divf %41, %42 : vector<4x32xf32>
    %44 = vector.extract_strided_slice %37 {offsets = [0, 32], sizes = [4, 32], strides = [1, 1]} : vector<4x64xf32> to vector<4x32xf32>
    %45 = arith.negf %44 : vector<4x32xf32>
    %46 = math.exp %45 : vector<4x32xf32>
    %cst_19 = arith.constant 1.000000e+00 : f32
    %47 = vector.broadcast %cst_19 : f32 to vector<4x32xf32>
    %48 = arith.addf %47, %46 : vector<4x32xf32>
    %49 = arith.divf %47, %48 : vector<4x32xf32>
    %50 = arith.subf %49, %30 : vector<4x32xf32>
    %51 = arith.mulf %43, %50 : vector<4x32xf32>
    %52 = arith.addf %30, %51 : vector<4x32xf32>
    %c0_20 = arith.constant 0 : index
    %c1 = arith.constant 1 : index
    %c0_21 = arith.constant 0 : index
    %53 = vector.load %arg6[%c0_20, %c1, %c0_21] : memref<4x8x32xf32, #tpu.memory_space<vmem>>, vector<4x1x32xf32>
    %54 = vector.shape_cast %53 : vector<4x1x32xf32> to vector<4x32xf32>
    %55 = vector.shape_cast %52 : vector<4x32xf32> to vector<4x1x32xf32>
    tpu.vector_store %arg6[%c0_20, %c1, %c0_21], %55 {strides = array<i32>} : memref<4x8x32xf32, #tpu.memory_space<vmem>>, vector<4x1x32xf32>,
    %cst_22 = arith.constant dense<0.000000e+00> : vector<4x64xf32>
    %56 = tpu.matmul %52, %3, %cst_22 {dimension_numbers = #tpu.dot_dimension_numbers<[1], [0], [0], [1], [0, 0, 1, 1], [], []>} : vector<4x32xf32>, vector<32x64xf32>, vector<4x64xf32> -> vector<4x64xf32>
    %57 = vector.extract_strided_slice %10 {offsets = [0, 2, 0], sizes = [4, 1, 64], strides = [1, 1, 1]} : vector<4x8x64xf32> to vector<4x1x64xf32>
    %58 = vector.shape_cast %57 : vector<4x1x64xf32> to vector<4x64xf32>
    %59 = arith.addf %56, %58 : vector<4x64xf32>
    %60 = vector.extract_strided_slice %59 {offsets = [0, 0], sizes = [4, 32], strides = [1, 1]} : vector<4x64xf32> to vector<4x32xf32>
    %61 = arith.negf %60 : vector<4x32xf32>
    %62 = math.exp %61 : vector<4x32xf32>
    %cst_23 = arith.constant 1.000000e+00 : f32
    %63 = vector.broadcast %cst_23 : f32 to vector<4x32xf32>
    %64 = arith.addf %63, %62 : vector<4x32xf32>
    %65 = arith.divf %63, %64 : vector<4x32xf32>
    %66 = vector.extract_strided_slice %59 {offsets = [0, 32], sizes = [4, 32], strides = [1, 1]} : vector<4x64xf32> to vector<4x32xf32>
    %67 = arith.negf %66 : vector<4x32xf32>
    %68 = math.exp %67 : vector<4x32xf32>
    %cst_24 = arith.constant 1.000000e+00 : f32
    %69 = vector.broadcast %cst_24 : f32 to vector<4x32xf32>
    %70 = arith.addf %69, %68 : vector<4x32xf32>
    %71 = arith.divf %69, %70 : vector<4x32xf32>
    %72 = arith.subf %71, %52 : vector<4x32xf32>
    %73 = arith.mulf %65, %72 : vector<4x32xf32>
    %74 = arith.addf %52, %73 : vector<4x32xf32>
    %c0_25 = arith.constant 0 : index
    %c2 = arith.constant 2 : index
    %c0_26 = arith.constant 0 : index
    %75 = vector.load %arg6[%c0_25, %c2, %c0_26] : memref<4x8x32xf32, #tpu.memory_space<vmem>>, vector<4x1x32xf32>
    %76 = vector.shape_cast %75 : vector<4x1x32xf32> to vector<4x32xf32>
    %77 = vector.shape_cast %74 : vector<4x32xf32> to vector<4x1x32xf32>
    tpu.vector_store %arg6[%c0_25, %c2, %c0_26], %77 {strides = array<i32>} : memref<4x8x32xf32, #tpu.memory_space<vmem>>, vector<4x1x32xf32>,
    %cst_27 = arith.constant dense<0.000000e+00> : vector<4x64xf32>
    %78 = tpu.matmul %74, %3, %cst_27 {dimension_numbers = #tpu.dot_dimension_numbers<[1], [0], [0], [1], [0, 0, 1, 1], [], []>} : vector<4x32xf32>, vector<32x64xf32>, vector<4x64xf32> -> vector<4x64xf32>
    %79 = vector.extract_strided_slice %10 {offsets = [0, 3, 0], sizes = [4, 1, 64], strides = [1, 1, 1]} : vector<4x8x64xf32> to vector<4x1x64xf32>
    %80 = vector.shape_cast %79 : vector<4x1x64xf32> to vector<4x64xf32>
    %81 = arith.addf %78, %80 : vector<4x64xf32>
    %82 = vector.extract_strided_slice %81 {offsets = [0, 0], sizes = [4, 32], strides = [1, 1]} : vector<4x64xf32> to vector<4x32xf32>
    %83 = arith.negf %82 : vector<4x32xf32>
    %84 = math.exp %83 : vector<4x32xf32>
    %cst_28 = arith.constant 1.000000e+00 : f32
    %85 = vector.broadcast %cst_28 : f32 to vector<4x32xf32>
    %86 = arith.addf %85, %84 : vector<4x32xf32>
    %87 = arith.divf %85, %86 : vector<4x32xf32>
    %88 = vector.extract_strided_slice %81 {offsets = [0, 32], sizes = [4, 32], strides = [1, 1]} : vector<4x64xf32> to vector<4x32xf32>
    %89 = arith.negf %88 : vector<4x32xf32>
    %90 = math.exp %89 : vector<4x32xf32>
    %cst_29 = arith.constant 1.000000e+00 : f32
    %91 = vector.broadcast %cst_29 : f32 to vector<4x32xf32>
    %92 = arith.addf %91, %90 : vector<4x32xf32>
    %93 = arith.divf %91, %92 : vector<4x32xf32>
    %94 = arith.subf %93, %74 : vector<4x32xf32>
    %95 = arith.mulf %87, %94 : vector<4x32xf32>
    %96 = arith.addf %74, %95 : vector<4x32xf32>
    %c0_30 = arith.constant 0 : index
    %c3 = arith.constant 3 : index
    %c0_31 = arith.constant 0 : index
    %97 = vector.load %arg6[%c0_30, %c3, %c0_31] : memref<4x8x32xf32, #tpu.memory_space<vmem>>, vector<4x1x32xf32>
    %98 = vector.shape_cast %97 : vector<4x1x32xf32> to vector<4x32xf32>
    %99 = vector.shape_cast %96 : vector<4x32xf32> to vector<4x1x32xf32>
    tpu.vector_store %arg6[%c0_30, %c3, %c0_31], %99 {strides = array<i32>} : memref<4x8x32xf32, #tpu.memory_space<vmem>>, vector<4x1x32xf32>,
    %cst_32 = arith.constant dense<0.000000e+00> : vector<4x64xf32>
    %100 = tpu.matmul %96, %3, %cst_32 {dimension_numbers = #tpu.dot_dimension_numbers<[1], [0], [0], [1], [0, 0, 1, 1], [], []>} : vector<4x32xf32>, vector<32x64xf32>, vector<4x64xf32> -> vector<4x64xf32>
    %101 = vector.extract_strided_slice %10 {offsets = [0, 4, 0], sizes = [4, 1, 64], strides = [1, 1, 1]} : vector<4x8x64xf32> to vector<4x1x64xf32>
    %102 = vector.shape_cast %101 : vector<4x1x64xf32> to vector<4x64xf32>
    %103 = arith.addf %100, %102 : vector<4x64xf32>
    %104 = vector.extract_strided_slice %103 {offsets = [0, 0], sizes = [4, 32], strides = [1, 1]} : vector<4x64xf32> to vector<4x32xf32>
    %105 = arith.negf %104 : vector<4x32xf32>
    %106 = math.exp %105 : vector<4x32xf32>
    %cst_33 = arith.constant 1.000000e+00 : f32
    %107 = vector.broadcast %cst_33 : f32 to vector<4x32xf32>
    %108 = arith.addf %107, %106 : vector<4x32xf32>
    %109 = arith.divf %107, %108 : vector<4x32xf32>
    %110 = vector.extract_strided_slice %103 {offsets = [0, 32], sizes = [4, 32], strides = [1, 1]} : vector<4x64xf32> to vector<4x32xf32>
    %111 = arith.negf %110 : vector<4x32xf32>
    %112 = math.exp %111 : vector<4x32xf32>
    %cst_34 = arith.constant 1.000000e+00 : f32
    %113 = vector.broadcast %cst_34 : f32 to vector<4x32xf32>
    %114 = arith.addf %113, %112 : vector<4x32xf32>
    %115 = arith.divf %113, %114 : vector<4x32xf32>
    %116 = arith.subf %115, %96 : vector<4x32xf32>
    %117 = arith.mulf %109, %116 : vector<4x32xf32>
    %118 = arith.addf %96, %117 : vector<4x32xf32>
    %c0_35 = arith.constant 0 : index
    %c4 = arith.constant 4 : index
    %c0_36 = arith.constant 0 : index
    %119 = vector.load %arg6[%c0_35, %c4, %c0_36] : memref<4x8x32xf32, #tpu.memory_space<vmem>>, vector<4x1x32xf32>
    %120 = vector.shape_cast %119 : vector<4x1x32xf32> to vector<4x32xf32>
    %121 = vector.shape_cast %118 : vector<4x32xf32> to vector<4x1x32xf32>
    tpu.vector_store %arg6[%c0_35, %c4, %c0_36], %121 {strides = array<i32>} : memref<4x8x32xf32, #tpu.memory_space<vmem>>, vector<4x1x32xf32>,
    %cst_37 = arith.constant dense<0.000000e+00> : vector<4x64xf32>
    %122 = tpu.matmul %118, %3, %cst_37 {dimension_numbers = #tpu.dot_dimension_numbers<[1], [0], [0], [1], [0, 0, 1, 1], [], []>} : vector<4x32xf32>, vector<32x64xf32>, vector<4x64xf32> -> vector<4x64xf32>
    %123 = vector.extract_strided_slice %10 {offsets = [0, 5, 0], sizes = [4, 1, 64], strides = [1, 1, 1]} : vector<4x8x64xf32> to vector<4x1x64xf32>
    %124 = vector.shape_cast %123 : vector<4x1x64xf32> to vector<4x64xf32>
    %125 = arith.addf %122, %124 : vector<4x64xf32>
    %126 = vector.extract_strided_slice %125 {offsets = [0, 0], sizes = [4, 32], strides = [1, 1]} : vector<4x64xf32> to vector<4x32xf32>
    %127 = arith.negf %126 : vector<4x32xf32>
    %128 = math.exp %127 : vector<4x32xf32>
    %cst_38 = arith.constant 1.000000e+00 : f32
    %129 = vector.broadcast %cst_38 : f32 to vector<4x32xf32>
    %130 = arith.addf %129, %128 : vector<4x32xf32>
    %131 = arith.divf %129, %130 : vector<4x32xf32>
    %132 = vector.extract_strided_slice %125 {offsets = [0, 32], sizes = [4, 32], strides = [1, 1]} : vector<4x64xf32> to vector<4x32xf32>
    %133 = arith.negf %132 : vector<4x32xf32>
    %134 = math.exp %133 : vector<4x32xf32>
    %cst_39 = arith.constant 1.000000e+00 : f32
    %135 = vector.broadcast %cst_39 : f32 to vector<4x32xf32>
    %136 = arith.addf %135, %134 : vector<4x32xf32>
    %137 = arith.divf %135, %136 : vector<4x32xf32>
    %138 = arith.subf %137, %118 : vector<4x32xf32>
    %139 = arith.mulf %131, %138 : vector<4x32xf32>
    %140 = arith.addf %118, %139 : vector<4x32xf32>
    %c0_40 = arith.constant 0 : index
    %c5 = arith.constant 5 : index
    %c0_41 = arith.constant 0 : index
    %141 = vector.load %arg6[%c0_40, %c5, %c0_41] : memref<4x8x32xf32, #tpu.memory_space<vmem>>, vector<4x1x32xf32>
    %142 = vector.shape_cast %141 : vector<4x1x32xf32> to vector<4x32xf32>
    %143 = vector.shape_cast %140 : vector<4x32xf32> to vector<4x1x32xf32>
    tpu.vector_store %arg6[%c0_40, %c5, %c0_41], %143 {strides = array<i32>} : memref<4x8x32xf32, #tpu.memory_space<vmem>>, vector<4x1x32xf32>,
    %cst_42 = arith.constant dense<0.000000e+00> : vector<4x64xf32>
    %144 = tpu.matmul %140, %3, %cst_42 {dimension_numbers = #tpu.dot_dimension_numbers<[1], [0], [0], [1], [0, 0, 1, 1], [], []>} : vector<4x32xf32>, vector<32x64xf32>, vector<4x64xf32> -> vector<4x64xf32>
    %145 = vector.extract_strided_slice %10 {offsets = [0, 6, 0], sizes = [4, 1, 64], strides = [1, 1, 1]} : vector<4x8x64xf32> to vector<4x1x64xf32>
    %146 = vector.shape_cast %145 : vector<4x1x64xf32> to vector<4x64xf32>
    %147 = arith.addf %144, %146 : vector<4x64xf32>
    %148 = vector.extract_strided_slice %147 {offsets = [0, 0], sizes = [4, 32], strides = [1, 1]} : vector<4x64xf32> to vector<4x32xf32>
    %149 = arith.negf %148 : vector<4x32xf32>
    %150 = math.exp %149 : vector<4x32xf32>
    %cst_43 = arith.constant 1.000000e+00 : f32
    %151 = vector.broadcast %cst_43 : f32 to vector<4x32xf32>
    %152 = arith.addf %151, %150 : vector<4x32xf32>
    %153 = arith.divf %151, %152 : vector<4x32xf32>
    %154 = vector.extract_strided_slice %147 {offsets = [0, 32], sizes = [4, 32], strides = [1, 1]} : vector<4x64xf32> to vector<4x32xf32>
    %155 = arith.negf %154 : vector<4x32xf32>
    %156 = math.exp %155 : vector<4x32xf32>
    %cst_44 = arith.constant 1.000000e+00 : f32
    %157 = vector.broadcast %cst_44 : f32 to vector<4x32xf32>
    %158 = arith.addf %157, %156 : vector<4x32xf32>
    %159 = arith.divf %157, %158 : vector<4x32xf32>
    %160 = arith.subf %159, %140 : vector<4x32xf32>
    %161 = arith.mulf %153, %160 : vector<4x32xf32>
    %162 = arith.addf %140, %161 : vector<4x32xf32>
    %c0_45 = arith.constant 0 : index
    %c6 = arith.constant 6 : index
    %c0_46 = arith.constant 0 : index
    %163 = vector.load %arg6[%c0_45, %c6, %c0_46] : memref<4x8x32xf32, #tpu.memory_space<vmem>>, vector<4x1x32xf32>
    %164 = vector.shape_cast %163 : vector<4x1x32xf32> to vector<4x32xf32>
    %165 = vector.shape_cast %162 : vector<4x32xf32> to vector<4x1x32xf32>
    tpu.vector_store %arg6[%c0_45, %c6, %c0_46], %165 {strides = array<i32>} : memref<4x8x32xf32, #tpu.memory_space<vmem>>, vector<4x1x32xf32>,
    %cst_47 = arith.constant dense<0.000000e+00> : vector<4x64xf32>
    %166 = tpu.matmul %162, %3, %cst_47 {dimension_numbers = #tpu.dot_dimension_numbers<[1], [0], [0], [1], [0, 0, 1, 1], [], []>} : vector<4x32xf32>, vector<32x64xf32>, vector<4x64xf32> -> vector<4x64xf32>
    %167 = vector.extract_strided_slice %10 {offsets = [0, 7, 0], sizes = [4, 1, 64], strides = [1, 1, 1]} : vector<4x8x64xf32> to vector<4x1x64xf32>
    %168 = vector.shape_cast %167 : vector<4x1x64xf32> to vector<4x64xf32>
    %169 = arith.addf %166, %168 : vector<4x64xf32>
    %170 = vector.extract_strided_slice %169 {offsets = [0, 0], sizes = [4, 32], strides = [1, 1]} : vector<4x64xf32> to vector<4x32xf32>
    %171 = arith.negf %170 : vector<4x32xf32>
    %172 = math.exp %171 : vector<4x32xf32>
    %cst_48 = arith.constant 1.000000e+00 : f32
    %173 = vector.broadcast %cst_48 : f32 to vector<4x32xf32>
    %174 = arith.addf %173, %172 : vector<4x32xf32>
    %175 = arith.divf %173, %174 : vector<4x32xf32>
    %176 = vector.extract_strided_slice %169 {offsets = [0, 32], sizes = [4, 32], strides = [1, 1]} : vector<4x64xf32> to vector<4x32xf32>
    %177 = arith.negf %176 : vector<4x32xf32>
    %178 = math.exp %177 : vector<4x32xf32>
    %cst_49 = arith.constant 1.000000e+00 : f32
    %179 = vector.broadcast %cst_49 : f32 to vector<4x32xf32>
    %180 = arith.addf %179, %178 : vector<4x32xf32>
    %181 = arith.divf %179, %180 : vector<4x32xf32>
    %182 = arith.subf %181, %162 : vector<4x32xf32>
    %183 = arith.mulf %175, %182 : vector<4x32xf32>
    %184 = arith.addf %162, %183 : vector<4x32xf32>
    %c0_50 = arith.constant 0 : index
    %c7 = arith.constant 7 : index
    %c0_51 = arith.constant 0 : index
    %185 = vector.load %arg6[%c0_50, %c7, %c0_51] : memref<4x8x32xf32, #tpu.memory_space<vmem>>, vector<4x1x32xf32>
    %186 = vector.shape_cast %185 : vector<4x1x32xf32> to vector<4x32xf32>
    %187 = vector.shape_cast %184 : vector<4x32xf32> to vector<4x1x32xf32>
    tpu.vector_store %arg6[%c0_50, %c7, %c0_51], %187 {strides = array<i32>} : memref<4x8x32xf32, #tpu.memory_space<vmem>>, vector<4x1x32xf32>,
    %c0_52 = arith.constant 0 : index
    %c0_53 = arith.constant 0 : index
    %188 = vector.load %arg7[%c0_52, %c0_53] : memref<4x32xf32, #tpu.memory_space<vmem>>, vector<4x32xf32>
    tpu.vector_store %arg7[%c0_52, %c0_53], %184 {strides = array<i32>} : memref<4x32xf32, #tpu.memory_space<vmem>>, vector<4x32xf32>,
    return
  }
  func.func @transform_0(%arg0: i32) -> (i32, i32, i32) {
    %c0_i32 = arith.constant 0 : i32
    %c0_i32_0 = arith.constant 0 : i32
    %c0_i32_1 = arith.constant 0 : i32
    return %c0_i32, %arg0, %c0_i32_0 : i32, i32, i32
  }
  func.func @transform_1(%arg0: i32) -> (i32, i32) {
    %c0_i32 = arith.constant 0 : i32
    %c0_i32_0 = arith.constant 0 : i32
    %c0_i32_1 = arith.constant 0 : i32
    return %c0_i32, %c0_i32_0 : i32, i32
  }
  func.func @transform_2(%arg0: i32) -> (i32, i32) {
    %c0_i32 = arith.constant 0 : i32
    %c0_i32_0 = arith.constant 0 : i32
    %c0_i32_1 = arith.constant 0 : i32
    return %c0_i32, %c0_i32_0 : i32, i32
  }
  func.func @transform_3(%arg0: i32) -> (i32, i32) {
    %c0_i32 = arith.constant 0 : i32
    %c0_i32_0 = arith.constant 0 : i32
    %c0_i32_1 = arith.constant 0 : i32
    return %c0_i32, %c0_i32_0 : i32, i32
  }
  func.func @transform_4(%arg0: i32) -> (i32, i32) {
    %c0_i32 = arith.constant 0 : i32
    %c0_i32_0 = arith.constant 0 : i32
    %c0_i32_1 = arith.constant 0 : i32
    return %c0_i32, %c0_i32_0 : i32, i32
  }
  func.func @transform_5(%arg0: i32) -> (i32, i32, i32) {
    %c0_i32 = arith.constant 0 : i32
    %c0_i32_0 = arith.constant 0 : i32
    %c0_i32_1 = arith.constant 0 : i32
    return %c0_i32, %arg0, %c0_i32_0 : i32, i32, i32
  }
}

</mosaic_0001>

<bundles_post_ra>
// kernel: multiscale_rnn_batch.1
= control target key start
LH: loop header
LB: loop body
LE: loop exit
PB: predicated region body
PF: predicated region fallthrough
CT: control target
= control target key end

     0   :  { %vm56_vm0 = vcmask 1042432   ;;  %vm43_vm1 = vcmask 23552   ;;  %v1439_v3 = vmov 0.0|0.0   ;;  %vm25_vm2 = vcmask 257024   ;;  %s1803_s3 = inlined_call_operand.vmem [shape: f32[3,64], index: 3, kind: input, shape index: {}]   ;;  %s1804_s0 = inlined_call_operand.vmem [shape: f32[4,8,3], index: 0, kind: input, shape index: {}]   ;;  %s1805_s2 = inlined_call_operand.vmem [shape: f32[32,64], index: 2, kind: input, shape index: {}]   ;;  %s1806_s1 = inlined_call_operand.vmem [shape: f32[4,32], index: 1, kind: input, shape index: {}]   ;;  %s1807_s4 = inlined_call_operand.vmem [shape: f32[1,64], index: 4, kind: input, shape index: {}]   ;;  %s1808_s5 = inlined_call_operand.vmem [shape: f32[4,8,32], index: 5, kind: output, shape index: {}]  }
   0x1   :  { %v31_v0 = vld [vmem:[%s1803_s3] sm:$0x7]  ;;  %v33_v2 = vld [vmem:[%s1804_s0 + $0x8] sm:$0xff]  ;;  %1353 = vmatprep.subr.bf16.mxu1 %v1439_v3  ;;  %v34_v4 = vld [vmem:[%s1804_s0 + $0x10] sm:$0xff]  ;;  %vm1440_vm3 = vmmov 0   ;;  %v1441_v10 = vmov 0.0  }
   0x2   :  { %v32_v1 = vld [vmem:[%s1804_s0] sm:$0xff]  ;;  %1257 = vmatprep.subr.msk.mxu0 %vm56_vm0, %v31_v0  ;;  %v28_v6 = vld [vmem:[%s1805_s2 + $0x8] sm:$0xff]  ;;  %v29_v8 = vld [vmem:[%s1805_s2 + $0x10] sm:$0xff]  ;;  %1273 = vmatprep.mubr.msk.f32.mxu1 %vm1440_vm3, %v1441_v10  ;;  %vm160_vm4 = vcmask 261120   ;;  %vm151_vm5 = vcmask 1041409   ;;  %vm154_vm6 = vcmask 1042434  }
   0x3   :  { %1259 = vmatprep.mubr.msk.f32.mxu0 %vm43_vm1, %v32_v1  ;;  %v27_v5 = vld [vmem:[%s1805_s2] sm:$0xff]  ;;  %1258 = vmatpush3.msk.msra.mxu0 %vm56_vm0, %v31_v0  ;;  %v30_v9 = vld [vmem:[%s1805_s2 + $0x18] sm:$0xff]  ;;  %vm157_vm7 = vcmask 1043459   ;;  %vm279_vm8 = vcmask 253952  }
   0x4   :  { %v1497_v7 = vpack.c.bf16 %v28_v6, %v27_v5  ;;  %1260 = vmatmul.mubr.msk.f32.vlgmr.msra.gmra.mrb[0].mxu0 %vm43_vm1, %v33_v2  ;;  %v24_v11 = vld [vmem:[%s1806_s1] sm:$0xf]  ;;  %1359 = vmatprep.subr.bf16.mxu0 %v1439_v3  ;;  %v35_v12 = vld [vmem:[%s1804_s0 + $0x18] sm:$0xff]  ;;  %v1517_v13 = vpack.c.bf16 %v30_v9, %v29_v8  ;;  %s1442_s0 = smov 32  }
   0x5   :  { %1262 = vmatprep.mubr.msk.f32.mxu0 %vm43_vm1, %v34_v4  ;;  %26 = vst.msk [vmem:[#allocation2] sm:$0xf] %vm25_vm2, %v24_v11  ;;  %v1190_v15 = vld [vmem:[%s1807_s4] ss:$0 sm:$0xff]  ;;  %s1443_s4 = smov 96  }
   0x6   :  { %1355 = vmatpush3.bf16.msra.mxu1 %v1497_v7  ;;  %1361 = vmatpush3.bf16.msra.mxu0 %v1497_v7 }
   0x7   :  { %1356 = vmatprep.subr.bf16.mxu1 %v1439_v3  ;;  %1362 = vmatprep.subr.bf16.mxu0 %v1439_v3 }
   0x8   :  { %1263 = vmatmul.mubr.msk.f32.gmra.mrb[2].mxu0 %vm43_vm1, %v35_v12 }
   0x9   :  { %1284 = vmatprep.mubr.msk.f32.mxu0 %vm1440_vm3, %v1441_v10 }
   0xa   :  { %1358 = vmatpush3.bf16.msra.mxu1 %v1517_v13  ;;  %1364 = vmatpush3.bf16.msra.mxu0 %v1517_v13 }
   0xb   :  { %1365 = vmatprep.subr.bf16.mxu1 %v1439_v3  ;;  %1371 = vmatprep.subr.bf16.mxu0 %v1439_v3 }
   0xc   :  { %v1530_v14 = vld [vmem:[#allocation2] sm:$0xf] }
   0xd   :  { %1274 = vmatmul.mubr.msk.f32.vlgmr.msra.gmra.mrb[0].mxu1 %vm160_vm4, %v1530_v14  ;;  %240 = vrot.lane.b32.xlu0 %v1530_v14, %s1442_s0 }
   0xe   :  { %1367 = vmatpush3.bf16.msra.mxu1 %v1497_v7  ;;  %1295 = vmatprep.mubr.msk.f32.mxu1 %vm1440_vm3, %v1441_v10 }
   0xf   :  { %1368 = vmatprep.subr.bf16.mxu1 %v1439_v3 }
  0x12   :  { %1370 = vmatpush3.bf16.msra.mxu1 %v1517_v13 }
  0x13   :  { %1377 = vmatprep.subr.bf16.mxu1 %v1439_v3 }
  0xd7   :  { %v1261_v16 = vpop.f32.mrb[0].mxu0 }
  0xd8   :  { %v1545_v17 = vadd.f32 %v1261_v16, %v1190_v15  ;;  %v126_v18 = vpop.f32.mrb[1].mxu0 }
  0xd9   :  { %v127_v19 = vadd.f32 %v1190_v15, %v126_v18 }
  0xda   :  { %v150_v20 = vrot.slane %v1545_v17, 7  ;;  %v413_v21 = vrot.slane %v1545_v17, 1  ;;  %v541_v22 = vrot.slane %v1545_v17, 2  ;;  %v669_v23 = vrot.slane %v1545_v17, 3 }
  0xdb   :  { %v1264_v24 = vpop.f32.mrb[2].mxu0  ;;  %v284_v25 = vrot.slane %v127_v19, 1  ;;  %v412_v26 = vrot.slane %v127_v19, 2  ;;  %v540_v27 = vrot.slane %v127_v19, 3  ;;  %v668_v28 = vrot.slane %v127_v19, 4 }
  0xdc   :  { %v142_v29 = vadd.f32 %v1264_v24, %v1190_v15  ;;  %v136_v30 = vpop.f32.mrb[3].mxu0  ;;  %v152_v31 = vsel %vm151_vm5, %v150_v20, %v127_v19  ;;  %v797_v32 = vrot.slane %v127_v19, 5  ;;  %v798_v33 = vrot.slane %v1545_v17, 4 }
  0xdd   :  { %v137_v34 = vadd.f32 %v1190_v15, %v136_v30  ;;  %v285_v35 = vsel %vm151_vm5, %v1545_v17, %v284_v25  ;;  %v414_v36 = vsel %vm151_vm5, %v413_v21, %v412_v26  ;;  %v542_v37 = vsel %vm151_vm5, %v541_v22, %v540_v27 }
  0xde   :  { %v156_v38 = vrot.slane %v142_v29, 5  ;;  %v288_v39 = vrot.slane %v142_v29, 6  ;;  %v416_v40 = vrot.slane %v142_v29, 7  ;;  %v670_v41 = vsel %vm151_vm5, %v669_v23, %v668_v28  ;;  %v241_v23 = vpop.permute.xlu0 %240 }
  0xdf   :  { %v153_v42 = vrot.slane %v137_v34, 6  ;;  %v286_v43 = vrot.slane %v137_v34, 7  ;;  %v415_v44 = vsel %vm154_vm6, %v137_v34, %v414_v36  ;;  %v543_v45 = vrot.slane %v137_v34, 1 }
  0xe0   :  { %v230_v46 = vpop.f32.mrb[0].mxu1  ;;  %v1560_v47 = vsel %vm157_vm7, %v416_v40, %v415_v44  ;;  %v671_v48 = vrot.slane %v137_v34, 2  ;;  %v673_v49 = vrot.slane %v142_v29, 1  ;;  %v799_v50 = vsel %vm151_vm5, %v798_v33, %v797_v32 }
  0xe1   :  { %v155_v51 = vsel %vm154_vm6, %v153_v42, %v152_v31  ;;  %v1275_v52 = vpop.f32.mrb[1].mxu1  ;;  %v287_v53 = vsel %vm154_vm6, %v286_v43, %v285_v35  ;;  %v544_v54 = vsel %vm154_vm6, %v543_v45, %v542_v37  ;;  %v800_v55 = vrot.slane %v137_v34, 3 }
  0xe2   :  { %v158_v56 = vsel %vm157_vm7, %v156_v38, %v155_v51  ;;  %v289_v57 = vsel %vm157_vm7, %v288_v39, %v287_v53  ;;  %v1569_v58 = vsel %vm157_vm7, %v142_v29, %v544_v54  ;;  %v672_v59 = vsel %vm154_vm6, %v671_v48, %v670_v41 }
  0xe3   :  { %v231_v60 = vadd.f32 %v230_v46, %v158_v56  ;;  %v1573_v61 = vsel %vm157_vm7, %v673_v49, %v672_v59  ;;  %v801_v62 = vsel %vm154_vm6, %v800_v55, %v799_v50  ;;  %v802_v63 = vrot.slane %v142_v29, 2 }
  0xe4   :  { %v926_v0 = vrot.slane %v127_v19, 6  ;;  %v927_v1 = vrot.slane %v1545_v17, 5  ;;  %v929_v2 = vrot.slane %v137_v34, 4  ;;  %v1055_v6 = vrot.slane %v127_v19, 7 }
  0xe5   :  { %v1197_v4 = vmul.f32 -1.442695, %v231_v60  ;;  %v1578_v5 = vsel %vm157_vm7, %v802_v63, %v801_v62  ;;  %v1056_v8 = vrot.slane %v1545_v17, 6  ;;  %v931_v11 = vrot.slane %v142_v29, 3 }
  0xe6   :  { %v928_v9 = vsel %vm151_vm5, %v927_v1, %v926_v0  ;;  %v1058_v12 = vrot.slane %v137_v34, 5  ;;  %v1060_v18 = vrot.slane %v142_v29, 4  ;;  %v1444_v26 = vmov 1966171168  }
  0xe7   :  { %1407 = vpow2.f32 %v1197_v4  ;;  %v930_v15 = vsel %vm154_vm6, %v929_v2, %v928_v9  ;;  %v1057_v16 = vsel %vm151_vm5, %v1056_v8, %v1055_v6  ;;  %v252_v27 = vunpack.c.l.s4 %v1444_v26 }
  0xe8   :  { %v1585_v20 = vsel %vm157_vm7, %v931_v11, %v930_v15  ;;  %v1059_v21 = vsel %vm154_vm6, %v1058_v12, %v1057_v16  ;;  %v254_v28 = vlaneseq }
  0xe9   :  { %v1589_v22 = vsel %vm157_vm7, %v1060_v18, %v1059_v21  ;;  %v253_v29 = vunpack.c.0.s8 %v252_v27 }
  0xea   :  { %v255_v30 = vshrl.u32 %v254_v28, 7 }
  0xec   :  { %v1592_v32 = vsub.s32 %v253_v29, %v255_v30 }
  0xf1   :  { %v1408_v19 = vpop.eup %1407 }
  0xf2   :  { %v237_v17 = vadd.f32 1.0, %v1408_v19 }
  0xf4   :  { %1409 = vrcp.f32 %v237_v17 }
  0xfe   :  { %v1410_v24 = vpop.eup %1409 }
  0xff   :  { %v243_v25 = vsub.f32 %v1410_v24, %v241_v23 }
 0x101   :  { %245 = vrot.lane.b32.xlu0 %v243_v25, %s1443_s4 }
 0x173   :  { %v246_v31 = vpop.permute.xlu0 %245 }
 0x174   :  { %v248_v33 = vmul.f32 %v1410_v24, %v246_v31 }
 0x176   :  { %v249_v34 = vadd.f32 %v248_v33, %v1530_v14 }
 0x178   :  { %v257_v35 = vrot.slane %v249_v34, %v1592_v32  ;;  %369 = vrot.lane.b32.xlu1 %v249_v34, %s1442_s0  ;;  %1285 = vmatmul.mubr.msk.f32.vlgmr.msra.gmra.mrb[4].mxu0 %vm160_vm4, %v249_v34 }
 0x179   :  { %1373 = vmatpush3.bf16.msra.mxu0 %v1497_v7  ;;  %1306 = vmatprep.mubr.msk.f32.mxu0 %vm1440_vm3, %v1441_v10 }
 0x17a   :  { %v258_v36 = vcombine.high %v257_v35, %v257_v35  ;;  %v265_v37 = vrot.slane %v257_v35, %v1592_v32  ;;  %1374 = vmatprep.subr.bf16.mxu0 %v1439_v3 }
 0x17c   :  { %v272_v38 = vrot.slane %v258_v36, %v1592_v32  ;;  %v273_v14 = vcombine.high %v265_v37, %v265_v37  ;;  %280 = vst.msk [vmem:[%s1808_s5] sm:$0x1] %vm279_vm8, %v265_v37 }
 0x17d   :  { %1376 = vmatpush3.bf16.msra.mxu0 %v1517_v13 }
 0x17e   :  { %v274_v39 = vcombine.high %v272_v38, %v272_v38  ;;  %281 = vst.msk [vmem:[%s1808_s5 + $0x8] sm:$0x1] %vm279_vm8, %v272_v38  ;;  %282 = vst.msk [vmem:[%s1808_s5 + $0x10] sm:$0x1] %vm279_vm8, %v273_v14  ;;  %1383 = vmatprep.subr.bf16.mxu0 %v1439_v3 }
 0x180   :  { %283 = vst.msk [vmem:[%s1808_s5 + $0x18] sm:$0x1] %vm279_vm8, %v274_v39 }
 0x1ea   :  { %v370_v48 = vpop.permute.xlu1 %369 }
 0x24b   :  { %v359_v40 = vpop.f32.mrb[4].mxu0 }
 0x24c   :  { %v360_v41 = vadd.f32 %v359_v40, %v289_v57  ;;  %v1286_v42 = vpop.f32.mrb[5].mxu0 }
 0x24e   :  { %v1199_v43 = vmul.f32 -1.442695, %v360_v41 }
 0x250   :  { %1411 = vpow2.f32 %v1199_v43 }
 0x25a   :  { %v1412_v44 = vpop.eup %1411 }
 0x25b   :  { %v366_v45 = vadd.f32 1.0, %v1412_v44 }
 0x25d   :  { %1413 = vrcp.f32 %v366_v45 }
 0x267   :  { %v1414_v46 = vpop.eup %1413 }
 0x268   :  { %v372_v49 = vsub.f32 %v1414_v46, %v370_v48 }
 0x26a   :  { %374 = vrot.lane.b32.xlu1 %v372_v49, %s1443_s4 }
 0x2dc   :  { %v375_v50 = vpop.permute.xlu1 %374 }
 0x2dd   :  { %v377_v51 = vmul.f32 %v1414_v46, %v375_v50 }
 0x2df   :  { %v378_v52 = vadd.f32 %v377_v51, %v249_v34 }
 0x2e1   :  { %v386_v53 = vrot.slane %v378_v52, %v1592_v32  ;;  %497 = vrot.lane.b32.xlu0 %v378_v52, %s1442_s0  ;;  %1296 = vmatmul.mubr.msk.f32.vlgmr.msra.gmra.mrb[2].mxu1 %vm160_vm4, %v378_v52 }
 0x2e2   :  { %1379 = vmatpush3.bf16.msra.mxu1 %v1497_v7  ;;  %1317 = vmatprep.mubr.msk.f32.mxu1 %vm1440_vm3, %v1441_v10 }
 0x2e3   :  { %v387_v54 = vcombine.high %v386_v53, %v386_v53  ;;  %v394_v55 = vrot.slane %v386_v53, %v1592_v32  ;;  %1380 = vmatprep.subr.bf16.mxu1 %v1439_v3 }
 0x2e5   :  { %v401_v56 = vrot.slane %v387_v54, %v1592_v32  ;;  %v402_v57 = vcombine.high %v394_v55, %v394_v55  ;;  %408 = vst.msk [vmem:[%s1808_s5 + $0x1] sm:$0x1] %vm279_vm8, %v394_v55 }
 0x2e6   :  { %1382 = vmatpush3.bf16.msra.mxu1 %v1517_v13 }
 0x2e7   :  { %v403_v59 = vcombine.high %v401_v56, %v401_v56  ;;  %409 = vst.msk [vmem:[%s1808_s5 + $0x9] sm:$0x1] %vm279_vm8, %v401_v56  ;;  %410 = vst.msk [vmem:[%s1808_s5 + $0x11] sm:$0x1] %vm279_vm8, %v402_v57  ;;  %1389 = vmatprep.subr.bf16.mxu1 %v1439_v3 }
 0x2e9   :  { %411 = vst.msk [vmem:[%s1808_s5 + $0x19] sm:$0x1] %vm279_vm8, %v403_v59 }
 0x353   :  { %v498_v6 = vpop.permute.xlu0 %497 }
 0x3b4   :  { %v487_v60 = vpop.f32.mrb[2].mxu1 }
 0x3b5   :  { %v488_v62 = vadd.f32 %v487_v60, %v1560_v47  ;;  %v1297_v63 = vpop.f32.mrb[3].mxu1 }
 0x3b7   :  { %v1201_v0 = vmul.f32 -1.442695, %v488_v62 }
 0x3b9   :  { %1415 = vpow2.f32 %v1201_v0 }
 0x3c3   :  { %v1416_v1 = vpop.eup %1415 }
 0x3c4   :  { %v494_v2 = vadd.f32 1.0, %v1416_v1 }
 0x3c6   :  { %1417 = vrcp.f32 %v494_v2 }
 0x3d0   :  { %v1418_v4 = vpop.eup %1417 }
 0x3d1   :  { %v500_v8 = vsub.f32 %v1418_v4, %v498_v6 }
 0x3d3   :  { %502 = vrot.lane.b32.xlu1 %v500_v8, %s1443_s4 }
 0x445   :  { %v503_v9 = vpop.permute.xlu1 %502 }
 0x446   :  { %v505_v11 = vmul.f32 %v1418_v4, %v503_v9 }
 0x448   :  { %v506_v12 = vadd.f32 %v505_v11, %v378_v52 }
 0x44a   :  { %v514_v15 = vrot.slane %v506_v12, %v1592_v32  ;;  %625 = vrot.lane.b32.xlu0 %v506_v12, %s1442_s0  ;;  %1307 = vmatmul.mubr.msk.f32.vlgmr.msra.gmra.mrb[6].mxu0 %vm160_vm4, %v506_v12 }
 0x44b   :  { %1385 = vmatpush3.bf16.msra.mxu0 %v1497_v7  ;;  %1328 = vmatprep.mubr.msk.f32.mxu0 %vm1440_vm3, %v1441_v10 }
 0x44c   :  { %v515_v47 = vcombine.high %v514_v15, %v514_v15  ;;  %v522_v16 = vrot.slane %v514_v15, %v1592_v32  ;;  %1386 = vmatprep.subr.bf16.mxu0 %v1439_v3 }
 0x44e   :  { %v529_v18 = vrot.slane %v515_v47, %v1592_v32  ;;  %v530_v21 = vcombine.high %v522_v16, %v522_v16  ;;  %536 = vst.msk [vmem:[%s1808_s5 + $0x2] sm:$0x1] %vm279_vm8, %v522_v16 }
 0x44f   :  { %1388 = vmatpush3.bf16.msra.mxu0 %v1517_v13 }
 0x450   :  { %v531_v19 = vcombine.high %v529_v18, %v529_v18  ;;  %537 = vst.msk [vmem:[%s1808_s5 + $0xa] sm:$0x1] %vm279_vm8, %v529_v18  ;;  %538 = vst.msk [vmem:[%s1808_s5 + $0x12] sm:$0x1] %vm279_vm8, %v530_v21  ;;  %1395 = vmatprep.subr.bf16.mxu0 %v1439_v3 }
 0x452   :  { %539 = vst.msk [vmem:[%s1808_s5 + $0x1a] sm:$0x1] %vm279_vm8, %v531_v19 }
 0x4bc   :  { %v626_v29 = vpop.permute.xlu0 %625 }
 0x51d   :  { %v615_v17 = vpop.f32.mrb[6].mxu0 }
 0x51e   :  { %v616_v23 = vadd.f32 %v615_v17, %v1569_v58  ;;  %v1308_v24 = vpop.f32.mrb[7].mxu0 }
 0x520   :  { %v1203_v25 = vmul.f32 -1.442695, %v616_v23 }
 0x522   :  { %1419 = vpow2.f32 %v1203_v25 }
 0x52c   :  { %v1420_v26 = vpop.eup %1419 }
 0x52d   :  { %v622_v27 = vadd.f32 1.0, %v1420_v26 }
 0x52f   :  { %1421 = vrcp.f32 %v622_v27 }
 0x539   :  { %v1422_v28 = vpop.eup %1421 }
 0x53a   :  { %v628_v30 = vsub.f32 %v1422_v28, %v626_v29 }
 0x53c   :  { %630 = vrot.lane.b32.xlu1 %v628_v30, %s1443_s4 }
 0x5ae   :  { %v631_v31 = vpop.permute.xlu1 %630 }
 0x5af   :  { %v633_v33 = vmul.f32 %v1422_v28, %v631_v31 }
 0x5b1   :  { %v634_v34 = vadd.f32 %v633_v33, %v506_v12 }
 0x5b3   :  { %v642_v35 = vrot.slane %v634_v34, %v1592_v32  ;;  %754 = vrot.lane.b32.xlu0 %v634_v34, %s1442_s0  ;;  %1318 = vmatmul.mubr.msk.f32.vlgmr.msra.gmra.mrb[4].mxu1 %vm160_vm4, %v634_v34 }
 0x5b4   :  { %1391 = vmatpush3.bf16.msra.mxu1 %v1497_v7  ;;  %1339 = vmatprep.mubr.msk.f32.mxu1 %vm1440_vm3, %v1441_v10 }
 0x5b5   :  { %v643_v58 = vcombine.high %v642_v35, %v642_v35  ;;  %v650_v36 = vrot.slane %v642_v35, %v1592_v32  ;;  %1392 = vmatprep.subr.bf16.mxu1 %v1439_v3 }
 0x5b7   :  { %v657_v37 = vrot.slane %v643_v58, %v1592_v32  ;;  %v658_v38 = vcombine.high %v650_v36, %v650_v36  ;;  %664 = vst.msk [vmem:[%s1808_s5 + $0x3] sm:$0x1] %vm279_vm8, %v650_v36 }
 0x5b8   :  { %1394 = vmatpush3.bf16.msra.mxu1 %v1517_v13 }
 0x5b9   :  { %v659_v14 = vcombine.high %v657_v37, %v657_v37  ;;  %665 = vst.msk [vmem:[%s1808_s5 + $0xb] sm:$0x1] %vm279_vm8, %v657_v37  ;;  %666 = vst.msk [vmem:[%s1808_s5 + $0x13] sm:$0x1] %vm279_vm8, %v658_v38 }
 0x5bb   :  { %667 = vst.msk [vmem:[%s1808_s5 + $0x1b] sm:$0x1] %vm279_vm8, %v659_v14 }
 0x625   :  { %v755_v46 = vpop.permute.xlu0 %754 }
 0x686   :  { %v744_v39 = vpop.f32.mrb[4].mxu1 }
 0x687   :  { %v745_v40 = vadd.f32 %v744_v39, %v1573_v61  ;;  %v1319_v41 = vpop.f32.mrb[5].mxu1 }
 0x689   :  { %v1205_v42 = vmul.f32 -1.442695, %v745_v40 }
 0x68b   :  { %1423 = vpow2.f32 %v1205_v42 }
 0x695   :  { %v1424_v43 = vpop.eup %1423 }
 0x696   :  { %v751_v44 = vadd.f32 1.0, %v1424_v43 }
 0x698   :  { %1425 = vrcp.f32 %v751_v44 }
 0x6a2   :  { %v1426_v45 = vpop.eup %1425 }
 0x6a3   :  { %v757_v48 = vsub.f32 %v1426_v45, %v755_v46 }
 0x6a5   :  { %759 = vrot.lane.b32.xlu1 %v757_v48, %s1443_s4 }
 0x717   :  { %v760_v49 = vpop.permute.xlu1 %759 }
 0x718   :  { %v762_v50 = vmul.f32 %v1426_v45, %v760_v49 }
 0x71a   :  { %v763_v51 = vadd.f32 %v762_v50, %v634_v34 }
 0x71c   :  { %v771_v52 = vrot.slane %v763_v51, %v1592_v32  ;;  %883 = vrot.lane.b32.xlu0 %v763_v51, %s1442_s0  ;;  %1329 = vmatmul.mubr.msk.f32.vlgmr.msra.gmra.mrb[8].mxu0 %vm160_vm4, %v763_v51 }
 0x71d   :  { %1397 = vmatpush3.bf16.msra.mxu0 %v1497_v7  ;;  %1350 = vmatprep.mubr.msk.f32.mxu0 %vm1440_vm3, %v1441_v10 }
 0x71e   :  { %v772_v61 = vcombine.high %v771_v52, %v771_v52  ;;  %v779_v53 = vrot.slane %v771_v52, %v1592_v32  ;;  %1398 = vmatprep.subr.bf16.mxu0 %v1439_v3 }
 0x720   :  { %v786_v54 = vrot.slane %v772_v61, %v1592_v32  ;;  %v787_v55 = vcombine.high %v779_v53, %v779_v53  ;;  %793 = vst.msk [vmem:[%s1808_s5 + $0x4] sm:$0x1] %vm279_vm8, %v779_v53 }
 0x721   :  { %1400 = vmatpush3.bf16.msra.mxu0 %v1517_v13 }
 0x722   :  { %v788_v56 = vcombine.high %v786_v54, %v786_v54  ;;  %794 = vst.msk [vmem:[%s1808_s5 + $0xc] sm:$0x1] %vm279_vm8, %v786_v54  ;;  %795 = vst.msk [vmem:[%s1808_s5 + $0x14] sm:$0x1] %vm279_vm8, %v787_v55 }
 0x724   :  { %796 = vst.msk [vmem:[%s1808_s5 + $0x1c] sm:$0x1] %vm279_vm8, %v788_v56 }
 0x78e   :  { %v884_v62 = vpop.permute.xlu0 %883 }
 0x7ef   :  { %v873_v3 = vpop.f32.mrb[8].mxu0 }
 0x7f0   :  { %v874_v7 = vadd.f32 %v873_v3, %v1578_v5  ;;  %v1330_v10 = vpop.f32.mrb[9].mxu0 }
 0x7f2   :  { %v1207_v13 = vmul.f32 -1.442695, %v874_v7 }
 0x7f4   :  { %1427 = vpow2.f32 %v1207_v13 }
 0x7fe   :  { %v1428_v57 = vpop.eup %1427 }
 0x7ff   :  { %v880_v59 = vadd.f32 1.0, %v1428_v57 }
 0x801   :  { %1429 = vrcp.f32 %v880_v59 }
 0x80b   :  { %v1430_v60 = vpop.eup %1429 }
 0x80c   :  { %v886_v63 = vsub.f32 %v1430_v60, %v884_v62 }
 0x80e   :  { %888 = vrot.lane.b32.xlu1 %v886_v63, %s1443_s4 }
 0x880   :  { %v889_v0 = vpop.permute.xlu1 %888 }
 0x881   :  { %v891_v1 = vmul.f32 %v1430_v60, %v889_v0 }
 0x883   :  { %v892_v2 = vadd.f32 %v891_v1, %v763_v51 }
 0x885   :  { %v900_v4 = vrot.slane %v892_v2, %v1592_v32  ;;  %1012 = vrot.lane.b32.xlu0 %v892_v2, %s1442_s0  ;;  %1340 = vmatmul.mubr.msk.f32.vlgmr.msra.gmra.mrb[6].mxu1 %vm160_vm4, %v892_v2 }
 0x887   :  { %v901_v5 = vcombine.high %v900_v4, %v900_v4  ;;  %v908_v6 = vrot.slane %v900_v4, %v1592_v32 }
 0x889   :  { %v915_v8 = vrot.slane %v901_v5, %v1592_v32  ;;  %v916_v9 = vcombine.high %v908_v6, %v908_v6  ;;  %922 = vst.msk [vmem:[%s1808_s5 + $0x5] sm:$0x1] %vm279_vm8, %v908_v6 }
 0x88b   :  { %v917_v11 = vcombine.high %v915_v8, %v915_v8  ;;  %923 = vst.msk [vmem:[%s1808_s5 + $0xd] sm:$0x1] %vm279_vm8, %v915_v8  ;;  %924 = vst.msk [vmem:[%s1808_s5 + $0x15] sm:$0x1] %vm279_vm8, %v916_v9 }
 0x88d   :  { %925 = vst.msk [vmem:[%s1808_s5 + $0x1d] sm:$0x1] %vm279_vm8, %v917_v11 }
 0x8f7   :  { %v1013_v17 = vpop.permute.xlu0 %1012 }
 0x958   :  { %v1002_v12 = vpop.f32.mrb[6].mxu1 }
 0x959   :  { %v1003_v15 = vadd.f32 %v1002_v12, %v1585_v20  ;;  %v1341_v47 = vpop.f32.mrb[7].mxu1 }
 0x95b   :  { %v1209_v16 = vmul.f32 -1.442695, %v1003_v15 }
 0x95d   :  { %1431 = vpow2.f32 %v1209_v16 }
 0x967   :  { %v1432_v18 = vpop.eup %1431 }
 0x968   :  { %v1009_v21 = vadd.f32 1.0, %v1432_v18 }
 0x96a   :  { %1433 = vrcp.f32 %v1009_v21 }
 0x974   :  { %v1434_v19 = vpop.eup %1433 }
 0x975   :  { %v1015_v23 = vsub.f32 %v1434_v19, %v1013_v17 }
 0x977   :  { %1017 = vrot.lane.b32.xlu1 %v1015_v23, %s1443_s4 }
 0x9e9   :  { %v1018_v24 = vpop.permute.xlu1 %1017 }
 0x9ea   :  { %v1020_v25 = vmul.f32 %v1434_v19, %v1018_v24 }
 0x9ec   :  { %v1021_v26 = vadd.f32 %v1020_v25, %v892_v2 }
 0x9ee   :  { %v1029_v27 = vrot.slane %v1021_v26, %v1592_v32  ;;  %1141 = vrot.lane.b32.xlu0 %v1021_v26, %s1442_s0  ;;  %1351 = vmatmul.mubr.msk.f32.vlgmr.msra.gmra.mrb[10].mxu0 %vm160_vm4, %v1021_v26 }
 0x9f0   :  { %v1030_v20 = vcombine.high %v1029_v27, %v1029_v27  ;;  %v1037_v28 = vrot.slane %v1029_v27, %v1592_v32 }
 0x9f2   :  { %v1044_v29 = vrot.slane %v1030_v20, %v1592_v32  ;;  %v1045_v30 = vcombine.high %v1037_v28, %v1037_v28  ;;  %1051 = vst.msk [vmem:[%s1808_s5 + $0x6] sm:$0x1] %vm279_vm8, %v1037_v28 }
 0x9f4   :  { %v1046_v31 = vcombine.high %v1044_v29, %v1044_v29  ;;  %1052 = vst.msk [vmem:[%s1808_s5 + $0xe] sm:$0x1] %vm279_vm8, %v1044_v29  ;;  %1053 = vst.msk [vmem:[%s1808_s5 + $0x16] sm:$0x1] %vm279_vm8, %v1045_v30 }
 0x9f6   :  { %1054 = vst.msk [vmem:[%s1808_s5 + $0x1e] sm:$0x1] %vm279_vm8, %v1046_v31 }
 0xa60   :  { %v1142_v14 = vpop.permute.xlu0 %1141 }
 0xac1   :  { %v1131_v33 = vpop.f32.mrb[10].mxu0 }
 0xac2   :  { %v1132_v34 = vadd.f32 %v1131_v33, %v1589_v22  ;;  %v1352_v35 = vpop.f32.mrb[11].mxu0 }
 0xac4   :  { %v1211_v58 = vmul.f32 -1.442695, %v1132_v34 }
 0xac6   :  { %1435 = vpow2.f32 %v1211_v58 }
 0xad0   :  { %v1436_v36 = vpop.eup %1435 }
 0xad1   :  { %v1138_v37 = vadd.f32 1.0, %v1436_v36 }
 0xad3   :  { %1437 = vrcp.f32 %v1138_v37 }
 0xadd   :  { %v1438_v38 = vpop.eup %1437 }
 0xade   :  { %v1144_v39 = vsub.f32 %v1438_v38, %v1142_v14 }
 0xae0   :  { %1146 = vrot.lane.b32.xlu1 %v1144_v39, %s1443_s4 }
 0xb52   :  { %v1147_v40 = vpop.permute.xlu1 %1146 }
 0xb53   :  { %v1149_v41 = vmul.f32 %v1438_v38, %v1147_v40 }
 0xb55   :  { %v1150_v42 = vadd.f32 %v1149_v41, %v1021_v26 }
 0xb57   :  { %v1158_v43 = vrot.slane %v1150_v42, %v1592_v32  ;;  %1185 = vst.msk [vmem:[#allocation2] sm:$0xf] %vm25_vm2, %v1150_v42 }
 0xb59   :  { %v1159_v44 = vcombine.high %v1158_v43, %v1158_v43  ;;  %v1166_v22 = vrot.slane %v1158_v43, %v1592_v32 }
 0xb5b   :  { %v1173_v45 = vrot.slane %v1159_v44, %v1592_v32  ;;  %v1174_v46 = vcombine.high %v1166_v22, %v1166_v22  ;;  %1180 = vst.msk [vmem:[%s1808_s5 + $0x7] sm:$0x1] %vm279_vm8, %v1166_v22 }
 0xb5d   :  { %v1175_v48 = vcombine.high %v1173_v45, %v1173_v45  ;;  %1181 = vst.msk [vmem:[%s1808_s5 + $0xf] sm:$0x1] %vm279_vm8, %v1173_v45  ;;  %1182 = vst.msk [vmem:[%s1808_s5 + $0x17] sm:$0x1] %vm279_vm8, %v1174_v46 }
 0xb5f   :  { %1183 = vst.msk [vmem:[%s1808_s5 + $0x1f] sm:$0x1] %vm279_vm8, %v1175_v48 }

</bundles_post_ra>
